<compile_context>
chip_gen: v6e
topology: v6e:2x2x1
jax: 0.10.0
libtpu: 0.0.40
codegen_flags: <defaults>
</compile_context>

<pallas_src>
import functools

import jax
import jax.numpy as jnp
from jax import lax
from jax.experimental import pallas as pl
from jax.experimental.pallas import tpu as pltpu

LANE = 128


def _round_up(x, m):
    return (x + m - 1) // m * m


def _softplus(x):
    # PyTorch nn.Softplus (beta=1, threshold=20): linear for x > threshold.
    safe = jnp.minimum(x, 20.0)
    return jnp.where(x > 20.0, x, jnp.log(1.0 + jnp.exp(safe)))


def _euler_mlp_kernel(*refs, num_steps, num_linear):
    """refs = (dt_smem, y0, w0, b0, ..., w_{L-1}, b_{L-1}, out, y_scratch)."""
    dt_ref = refs[0]
    y0_ref = refs[1]
    params = refs[2:2 + 2 * num_linear]
    out_ref = refs[2 + 2 * num_linear]
    y_ref = refs[3 + 2 * num_linear]          # VMEM scratch accumulator

    dt = dt_ref[0]
    y_ref[...] = y0_ref[...]

    def mlp(h):
        for i in range(num_linear):
            w = params[2 * i][...]
            b = params[2 * i + 1][...]        # (1, out_p), broadcasts over rows
            h = jnp.dot(h, w, preferred_element_type=jnp.float32) + b
            if i == 0:
                h = jnp.tanh(h)               # Tanh after the first Linear
            elif i < num_linear - 1:
                h = _softplus(h)              # Softplus after middle Linears
        return h

    def step(_, carry):
        y = y_ref[...]
        y_ref[...] = y + mlp(y) * dt          # explicit Euler update
        return carry

    lax.fori_loop(0, num_steps, step, 0)
    out_ref[...] = y_ref[...]


def prepare_params(weights, biases):
    """One-time (outside the hot path) zero-padding of params to 128 lanes.

    weights[i]: (in_i, out_i) float32  (already transposed from PyTorch layout)
    biases[i] : (out_i,)      float32
    """
    prepared = []
    for w, b in zip(weights, biases):
        fi, fo = w.shape
        fi_p, fo_p = _round_up(fi, LANE), _round_up(fo, LANE)
        wp = jnp.zeros((fi_p, fo_p), jnp.float32).at[:fi, :fo].set(
            w.astype(jnp.float32))
        bp = jnp.zeros((1, fo_p), jnp.float32).at[0, :fo].set(
            b.astype(jnp.float32))
        prepared.append((wp, bp))
    return prepared


def neural_ode_forward(y0, t, prepared_params):
    """NeuralODE.forward(y0, t): Euler-integrate dy/dt = MLP(y), return final y.

    y0: (B, 1, D) or (B, D) float32
    t : (T,) float32 uniform grid (dt = t[1] - t[0], as in the torch solver)
    """
    orig_shape = y0.shape
    y2 = y0.reshape(y0.shape[0], -1)
    B, D = y2.shape
    num_steps = int(t.shape[0]) - 1
    num_linear = len(prepared_params)

    BP = _round_up(B, LANE)                   # lane-dense full MXU tiles
    DP = _round_up(D, LANE)

    y_pad = jnp.zeros((BP, DP), jnp.float32).at[:B, :D].set(
        y2.astype(jnp.float32))
    dt = (t[1] - t[0]).astype(jnp.float32).reshape(1)

    args = [dt, y_pad]
    in_specs = [
        pl.BlockSpec(memory_space=pltpu.MemorySpace.SMEM),   # dt scalar
        pl.BlockSpec(memory_space=pltpu.MemorySpace.VMEM),   # y0 (padded)
    ]
    for wp, bp in prepared_params:            # params resident in VMEM
        args += [wp, bp]
        in_specs += [pl.BlockSpec(memory_space=pltpu.MemorySpace.VMEM)] * 2

    kernel = functools.partial(
        _euler_mlp_kernel, num_steps=num_steps, num_linear=num_linear)

    out_pad = pl.pallas_call(
        kernel,
        out_shape=jax.ShapeDtypeStruct((BP, DP), jnp.float32),
        in_specs=in_specs,
        out_specs=pl.BlockSpec(memory_space=pltpu.MemorySpace.VMEM),
        scratch_shapes=[pltpu.VMEM((BP, DP), jnp.float32)],
    )(*args)

    out = out_pad[:B, :D].astype(y0.dtype)
    return out.reshape(orig_shape)


def _init_params(key, input_dim, hidden_dim, num_layers):
    """PyTorch-style uniform(+-1/sqrt(fan_in)) init; weights stored (in, out)."""
    dims = [input_dim] + [hidden_dim] * num_layers + [input_dim]
    weights, biases = [], []
    for i in range(len(dims) - 1):
        fan_in, fan_out = dims[i], dims[i + 1]
        key, kw, kb = jax.random.split(key, 3)
        bound = 1.0 / jnp.sqrt(float(fan_in))
        weights.append(
            jax.random.uniform(kw, (fan_in, fan_out), jnp.float32, -bound, bound))
        biases.append(
            jax.random.uniform(kb, (fan_out,), jnp.float32, -bound, bound))
    return weights, biases


def _reference_forward(y0, t, weights, biases):
    """Pure-JAX reference: basic Euler solver, final state (== out[-1])."""
    dt = t[1] - t[0]
    y = y0.reshape(y0.shape[0], -1)
    num_linear = len(weights)
    for _ in range(int(t.shape[0]) - 1):
        h = y
        for i, (w, b) in enumerate(zip(weights, biases)):
            h = h @ w + b
            if i == 0:
                h = jnp.tanh(h)
            elif i < num_linear - 1:
                h = _softplus(h)
        y = y + h * dt
    return y.reshape(y0.shape)


if __name__ == "__main__":
    # Exa5_3dim_RF-style config at small sizes.
    input_dim = 3
    hidden_dim = 32
    num_layers = 2          # -> Linear/Tanh, Linear/Softplus, Linear
    batch = 8
    num_t = 21              # 20 Euler steps over [0, 1]

    key = jax.random.PRNGKey(0)
    key, ky = jax.random.split(key)
    y0 = jax.random.normal(ky, (batch, 1, input_dim), jnp.float32)
    t = jnp.linspace(0.0, 1.0, num_t).astype(jnp.float32)

    weights, biases = _init_params(key, input_dim, hidden_dim, num_layers)
    params = prepare_params(weights, biases)     # padded once, outside hot path

    out = jax.jit(neural_ode_forward)(y0, t, params)
    out = jax.block_until_ready(out)

    ref = _reference_forward(y0, t, weights, biases)

    assert out.shape == y0.shape
    assert bool(jnp.all(jnp.isfinite(out)))
    max_err = float(jnp.max(jnp.abs(out - ref)))
    assert jnp.allclose(out, ref, atol=2e-3, rtol=2e-3), max_err

    print("KERNEL_OK")
</pallas_src>

<mosaic_0001>
module attributes {stable_mosaic.version = 11 : i64} {
  func.func @_euler_mlp_kernel(%arg0: memref<1xf32, #tpu.memory_space<smem>>, %arg1: memref<128x128xf32, #tpu.memory_space<vmem>>, %arg2: memref<128x128xf32, #tpu.memory_space<vmem>>, %arg3: memref<1x128xf32, #tpu.memory_space<vmem>>, %arg4: memref<128x128xf32, #tpu.memory_space<vmem>>, %arg5: memref<1x128xf32, #tpu.memory_space<vmem>>, %arg6: memref<128x128xf32, #tpu.memory_space<vmem>>, %arg7: memref<1x128xf32, #tpu.memory_space<vmem>>, %arg8: memref<128x128xf32, #tpu.memory_space<vmem>>, %arg9: memref<128x128xf32, #tpu.memory_space<vmem>>) attributes {dimension_semantics = [], scalar_prefetch = 0 : i64, scratch_operands = 1 : i64, tpu.core_type = #tpu.core_type<tc>} {
    %c0 = arith.constant 0 : index
    %0 = memref.load %arg0[%c0] : memref<1xf32, #tpu.memory_space<smem>>
    %c0_0 = arith.constant 0 : index
    %c0_1 = arith.constant 0 : index
    %1 = vector.load %arg1[%c0_0, %c0_1] : memref<128x128xf32, #tpu.memory_space<vmem>>, vector<128x128xf32>
    %c0_2 = arith.constant 0 : index
    %c0_3 = arith.constant 0 : index
    %2 = vector.load %arg9[%c0_2, %c0_3] : memref<128x128xf32, #tpu.memory_space<vmem>>, vector<128x128xf32>
    tpu.vector_store %arg9[%c0_2, %c0_3], %1 {strides = array<i32>} : memref<128x128xf32, #tpu.memory_space<vmem>>, vector<128x128xf32>,
    %c0_i32 = arith.constant 0 : i32
    %c20_i32 = arith.constant 20 : i32
    %3 = arith.addi %c0_i32, %c20_i32 : i32
    %c1_i32 = arith.constant 1 : i32
    scf.for %arg10 = %c0_i32 to %3 step %c1_i32  : i32 {
      %c0_8 = arith.constant 0 : index
      %c0_9 = arith.constant 0 : index
      %6 = vector.load %arg9[%c0_8, %c0_9] : memref<128x128xf32, #tpu.memory_space<vmem>>, vector<128x128xf32>
      %c0_10 = arith.constant 0 : index
      %c0_11 = arith.constant 0 : index
      %7 = vector.load %arg2[%c0_10, %c0_11] : memref<128x128xf32, #tpu.memory_space<vmem>>, vector<128x128xf32>
      %c0_12 = arith.constant 0 : index
      %c0_13 = arith.constant 0 : index
      %8 = vector.load %arg3[%c0_12, %c0_13] : memref<1x128xf32, #tpu.memory_space<vmem>>, vector<1x128xf32>
      %cst = arith.constant dense<0.000000e+00> : vector<128x128xf32>
      %9 = tpu.matmul %6, %7, %cst {dimension_numbers = #tpu.dot_dimension_numbers<[1], [0], [0], [1], [0, 0, 1, 1], [], []>} : vector<128x128xf32>, vector<128x128xf32>, vector<128x128xf32> -> vector<128x128xf32>
      %10 = vector.broadcast %8 : vector<1x128xf32> to vector<128x128xf32>
      %11 = arith.addf %9, %10 : vector<128x128xf32>
      %12 = math.tanh %11 : vector<128x128xf32>
      %c0_14 = arith.constant 0 : index
      %c0_15 = arith.constant 0 : index
      %13 = vector.load %arg4[%c0_14, %c0_15] : memref<128x128xf32, #tpu.memory_space<vmem>>, vector<128x128xf32>
      %c0_16 = arith.constant 0 : index
      %c0_17 = arith.constant 0 : index
      %14 = vector.load %arg5[%c0_16, %c0_17] : memref<1x128xf32, #tpu.memory_space<vmem>>, vector<1x128xf32>
      %cst_18 = arith.constant dense<0.000000e+00> : vector<128x128xf32>
      %15 = tpu.matmul %12, %13, %cst_18 {dimension_numbers = #tpu.dot_dimension_numbers<[1], [0], [0], [1], [0, 0, 1, 1], [], []>} : vector<128x128xf32>, vector<128x128xf32>, vector<128x128xf32> -> vector<128x128xf32>
      %16 = vector.broadcast %14 : vector<1x128xf32> to vector<128x128xf32>
      %17 = arith.addf %15, %16 : vector<128x128xf32>
      %cst_19 = arith.constant 2.000000e+01 : f32
      %18 = vector.broadcast %cst_19 : f32 to vector<128x128xf32>
      %19 = arith.minimumf %17, %18 : vector<128x128xf32>
      %cst_20 = arith.constant 2.000000e+01 : f32
      %20 = vector.broadcast %cst_20 : f32 to vector<128x128xf32>
      %21 = arith.cmpf ogt, %17, %20 : vector<128x128xf32>
      %22 = math.exp %19 : vector<128x128xf32>
      %cst_21 = arith.constant 1.000000e+00 : f32
      %23 = vector.broadcast %cst_21 : f32 to vector<128x128xf32>
      %24 = arith.addf %23, %22 : vector<128x128xf32>
      %25 = math.log %24 : vector<128x128xf32>
      %26 = arith.select %21, %17, %25 : vector<128x128xi1>, vector<128x128xf32>
      %c0_22 = arith.constant 0 : index
      %c0_23 = arith.constant 0 : index
      %27 = vector.load %arg6[%c0_22, %c0_23] : memref<128x128xf32, #tpu.memory_space<vmem>>, vector<128x128xf32>
      %c0_24 = arith.constant 0 : index
      %c0_25 = arith.constant 0 : index
      %28 = vector.load %arg7[%c0_24, %c0_25] : memref<1x128xf32, #tpu.memory_space<vmem>>, vector<1x128xf32>
      %cst_26 = arith.constant dense<0.000000e+00> : vector<128x128xf32>
      %29 = tpu.matmul %26, %27, %cst_26 {dimension_numbers = #tpu.dot_dimension_numbers<[1], [0], [0], [1], [0, 0, 1, 1], [], []>} : vector<128x128xf32>, vector<128x128xf32>, vector<128x128xf32> -> vector<128x128xf32>
      %30 = vector.broadcast %28 : vector<1x128xf32> to vector<128x128xf32>
      %31 = arith.addf %29, %30 : vector<128x128xf32>
      %32 = vector.broadcast %0 : f32 to vector<128x128xf32>
      %33 = arith.mulf %31, %32 : vector<128x128xf32>
      %34 = arith.addf %6, %33 : vector<128x128xf32>
      %c0_27 = arith.constant 0 : index
      %c0_28 = arith.constant 0 : index
      %35 = vector.load %arg9[%c0_27, %c0_28] : memref<128x128xf32, #tpu.memory_space<vmem>>, vector<128x128xf32>
      tpu.vector_store %arg9[%c0_27, %c0_28], %34 {strides = array<i32>} : memref<128x128xf32, #tpu.memory_space<vmem>>, vector<128x128xf32>,
    }
    %c0_4 = arith.constant 0 : index
    %c0_5 = arith.constant 0 : index
    %4 = vector.load %arg9[%c0_4, %c0_5] : memref<128x128xf32, #tpu.memory_space<vmem>>, vector<128x128xf32>
    %c0_6 = arith.constant 0 : index
    %c0_7 = arith.constant 0 : index
    %5 = vector.load %arg8[%c0_6, %c0_7] : memref<128x128xf32, #tpu.memory_space<vmem>>, vector<128x128xf32>
    tpu.vector_store %arg8[%c0_6, %c0_7], %4 {strides = array<i32>} : memref<128x128xf32, #tpu.memory_space<vmem>>, vector<128x128xf32>,
    return
  }
}

</mosaic_0001>

<bundles_post_ra>
// kernel: neural_ode_forward.1
= control target key start
LH: loop header
LB: loop body
LE: loop exit
PB: predicated region body
PF: predicated region fallthrough
CT: control target
= control target key end

     0   :  { %14 = vsyncpa [#allocation5], 0  ;;  %s1729_s0 = inlined_call_operand.<no memory space> [shape: f32[1], index: 0, kind: input, shape index: {}]   ;;  %s1730_s1 = inlined_call_operand.vmem [shape: f32[128,128], index: 1, kind: input, shape index: {}]   ;;  %s1731_s2 = inlined_call_operand.vmem [shape: f32[128,128], index: 2, kind: input, shape index: {}]   ;;  %s1732_s3 = inlined_call_operand.vmem [shape: f32[1,128], index: 3, kind: input, shape index: {}]   ;;  %s1733_s4 = inlined_call_operand.hbm [shape: f32[128,128], index: 4, kind: input, shape index: {}]   ;;  %s1734_s5 = inlined_call_operand.vmem [shape: f32[1,128], index: 5, kind: input, shape index: {}]   ;;  %s1735_s6 = inlined_call_operand.hbm [shape: f32[128,128], index: 6, kind: input, shape index: {}]   ;;  %s1736_s7 = inlined_call_operand.vmem [shape: f32[1,128], index: 7, kind: input, shape index: {}]   ;;  %s1737_s8 = inlined_call_operand.vmem [shape: f32[128,128], index: 8, kind: output, shape index: {}]  }
   0x1   :  { %15 = vsyncpa [#allocation7], 0  ;;  %s1312_s27 = smov [#allocation4]  }
   0x2   :  { %s29_s28 = sshll.u32 %s1312_s27, 4  ;;  %s30_s28 = int_to_ptr.vmem [resolvable:$true] %s29_s28 }
   0x3   :  { %s1268_s29 = scalar_lea.vmem %s30_s28, 2048  ;;  %p1273_p1 = scmp.lt.s32.totalorder %s30_s28, %s30_s28 }
   0x4   :  { %p1269_p0 = scmp.ne.s32.totalorder %s30_s28, %s1268_s29  ;;  %p1274_p2 = scmp.lt.s32.totalorder %s1268_s29, %s1268_s29 }
   0x6   :  { %p1275_p3 = por %p1274_p2, %p1273_p1 }
   0x8   :  { %p1276_p4 = pnand %p1275_p3, %p1269_p0 }
   0xa   :  { %1279 = shalt.err (!%p1276_p4)
}
   0xb   :  { %s1313_s30 = smov 128   ;;  %s1314_s9 = smov 8  }
   0xc   :  { %35 = dma.hbm_to_vmem [thread:$0]  %s1733_s4, 2048, %s30_s28, [#allocation5], %s1313_s30, %s1313_s30, %s1314_s9  }
   0xd   :  { %s1315_s12 = smov [#allocation6]  }
   0xe   :  { %s43_s13 = sshll.u32 %s1315_s12, 4  ;;  %s44_s13 = int_to_ptr.vmem [resolvable:$true] %s43_s13 }
   0xf   :  { %s1288_s14 = scalar_lea.vmem %s44_s13, 2048  ;;  %p1293_p6 = scmp.lt.s32.totalorder %s44_s13, %s44_s13 }
  0x10   :  { %p1289_p5 = scmp.ne.s32.totalorder %s44_s13, %s1288_s14  ;;  %p1294_p7 = scmp.lt.s32.totalorder %s1288_s14, %s1288_s14 }
  0x12   :  { %p1295_p8 = por %p1294_p7, %p1293_p6 }
  0x14   :  { %p1296_p9 = pnand %p1295_p8, %p1289_p5 }
  0x16   :  { %1299 = shalt.err (!%p1296_p9)
}
  0x17   :  { %49 = dma.hbm_to_vmem [thread:$0]  %s1735_s6, 2048, %s44_s13, [#allocation7], %s1313_s30, %s1313_s30, %s1314_s9  }
  0x18   :  { %1304 = dma.done.wait [#allocation5], 2048  }
  0x19   :  { %1305 = vsyncadd [#allocation5], 4294965248 }
  0x1a   :  { %1306 = dma.done.wait [#allocation7], 2048  }
  0x1b   :  { %1307 = vsyncadd [#allocation7], 4294965248  ;;  %v59_v0 = vld [vmem:[%s1730_s1] sm:$0xff]  ;;  %v60_v1 = vld [vmem:[%s1730_s1 + $0x8] sm:$0xff]  ;;  %s1415_s23 = smov 0  }
  0x1c   :  { %v61_v2 = vld [vmem:[%s1730_s1 + $0x10] sm:$0xff]  ;;  %75 = vst [vmem:[#allocation2 + $0x30] sm:$0xff] %v59_v0  ;;  %76 = vst [vmem:[#allocation2] sm:$0xff] %v60_v1  ;;  %v62_v3 = vld [vmem:[%s1730_s1 + $0x18] sm:$0xff] }
  0x1d   :  { %77 = vst [vmem:[#allocation2 + $0x58] sm:$0xff] %v61_v2  ;;  %v63_v4 = vld [vmem:[%s1730_s1 + $0x20] sm:$0xff]  ;;  %v64_v5 = vld [vmem:[%s1730_s1 + $0x28] sm:$0xff]  ;;  %78 = vst [vmem:[#allocation2 + $0x18] sm:$0xff] %v62_v3 }
  0x1e   :  { %79 = vst [vmem:[#allocation2 + $0x50] sm:$0xff] %v63_v4  ;;  %80 = vst [vmem:[#allocation2 + $0x68] sm:$0xff] %v64_v5  ;;  %v65_v6 = vld [vmem:[%s1730_s1 + $0x30] sm:$0xff]  ;;  %v66_v7 = vld [vmem:[%s1730_s1 + $0x38] sm:$0xff] }
  0x1f   :  { %v67_v8 = vld [vmem:[%s1730_s1 + $0x40] sm:$0xff]  ;;  %81 = vst [vmem:[#allocation2 + $0x8] sm:$0xff] %v65_v6  ;;  %82 = vst [vmem:[#allocation2 + $0x48] sm:$0xff] %v66_v7  ;;  %v68_v9 = vld [vmem:[%s1730_s1 + $0x48] sm:$0xff] }
  0x20   :  { %83 = vst [vmem:[#allocation2 + $0x40] sm:$0xff] %v67_v8  ;;  %v69_v10 = vld [vmem:[%s1730_s1 + $0x50] sm:$0xff]  ;;  %v70_v11 = vld [vmem:[%s1730_s1 + $0x58] sm:$0xff]  ;;  %84 = vst [vmem:[#allocation2 + $0x20] sm:$0xff] %v68_v9 }
  0x21   :  { %85 = vst [vmem:[#allocation2 + $0x10] sm:$0xff] %v69_v10  ;;  %86 = vst [vmem:[#allocation2 + $0x38] sm:$0xff] %v70_v11  ;;  %v71_v12 = vld [vmem:[%s1730_s1 + $0x60] sm:$0xff]  ;;  %v72_v13 = vld [vmem:[%s1730_s1 + $0x68] sm:$0xff] }
  0x22   :  { %v73_v14 = vld [vmem:[%s1730_s1 + $0x70] sm:$0xff]  ;;  %87 = vst [vmem:[#allocation2 + $0x60] sm:$0xff] %v71_v12  ;;  %88 = vst [vmem:[#allocation2 + $0x70] sm:$0xff] %v72_v13  ;;  %v74_v15 = vld [vmem:[%s1730_s1 + $0x78] sm:$0xff] }
  0x23   :  { %89 = vst [vmem:[#allocation2 + $0x78] sm:$0xff] %v73_v14  ;;  %90 = vst [vmem:[#allocation2 + $0x28] sm:$0xff] %v74_v15 }
  0x24 LB: > { %v128_v16 = vld [vmem:[%s1731_s2 + $0x78] sm:$0xff]  ;;  %v127_v17 = vld [vmem:[%s1731_s2 + $0x70] sm:$0xff]  ;;  %v126_v18 = vld [vmem:[%s1731_s2 + $0x68] sm:$0xff]  ;;  %s96_s23 = sadd.s32 1, %s1310_s23   ;;  %s1310_s23 = sphi %s1415_s23, %s96_s23  }
  0x25   : > { %952 = vmatprep.subr.mxu0 %v128_v16  ;;  %v125_v19 = vld [vmem:[%s1731_s2 + $0x60] sm:$0xff]  ;;  %v1432_v20 = vld [vmem:[#allocation2 + $0x30] sm:$0xff]  ;;  %v124_v21 = vld [vmem:[%s1731_s2 + $0x58] sm:$0xff]  ;;  %p93_p10 = scmp.ge.s32.totalorder %s96_s23, 20  }
  0x26   : > { %953 = vmatpush3.msra.mxu0 %v128_v16  ;;  %984 = vmatprep.mubr.f32.mxu0 %v1432_v20  ;;  %v123_v22 = vld [vmem:[%s1731_s2 + $0x50] sm:$0xff]  ;;  %v122_v23 = vld [vmem:[%s1731_s2 + $0x48] sm:$0xff]  ;;  %v312_v24 = vld [vmem:[#allocation4 + $0x78] sm:$0xff] }
  0x27   : > { %954 = vmatprep.subr.mxu0 %v127_v17  ;;  %1008 = vmatprep.subr.mxu1 %v312_v24  ;;  %v311_v25 = vld [vmem:[#allocation4 + $0x70] sm:$0xff]  ;;  %v121_v26 = vld [vmem:[%s1731_s2 + $0x40] sm:$0xff]  ;;  %v310_v27 = vld [vmem:[#allocation4 + $0x68] sm:$0xff] }
  0x28   : > { %955 = vmatpush3.msra.mxu0 %v127_v17  ;;  %1009 = vmatpush3.msra.mxu1 %v312_v24  ;;  %v120_v28 = vld [vmem:[%s1731_s2 + $0x38] sm:$0xff]  ;;  %v309_v29 = vld [vmem:[#allocation4 + $0x60] sm:$0xff]  ;;  %v119_v30 = vld [vmem:[%s1731_s2 + $0x30] sm:$0xff] }
  0x29   : > { %956 = vmatprep.subr.mxu0 %v126_v18  ;;  %1010 = vmatprep.subr.mxu1 %v311_v25  ;;  %v308_v31 = vld [vmem:[#allocation4 + $0x58] sm:$0xff]  ;;  %v118_v32 = vld [vmem:[%s1731_s2 + $0x28] sm:$0xff]  ;;  %v307_v33 = vld [vmem:[#allocation4 + $0x50] sm:$0xff] }
  0x2a   : > { %957 = vmatpush3.msra.mxu0 %v126_v18  ;;  %1011 = vmatpush3.msra.mxu1 %v311_v25  ;;  %v117_v34 = vld [vmem:[%s1731_s2 + $0x20] sm:$0xff]  ;;  %v116_v35 = vld [vmem:[%s1731_s2 + $0x18] sm:$0xff]  ;;  %v115_v36 = vld [vmem:[%s1731_s2 + $0x10] sm:$0xff] }
  0x2b   : > { %958 = vmatprep.subr.mxu0 %v125_v19  ;;  %1012 = vmatprep.subr.mxu1 %v310_v27  ;;  %v114_v37 = vld [vmem:[%s1731_s2 + $0x8] sm:$0xff]  ;;  %v113_v38 = vld [vmem:[%s1731_s2] sm:$0xff]  ;;  %v1473_v40 = vld [vmem:[#allocation2 + $0x58] sm:$0xff] }
  0x2c   : > { %959 = vmatpush3.msra.mxu0 %v125_v19  ;;  %1013 = vmatpush3.msra.mxu1 %v310_v27  ;;  %v1471_v39 = vld [vmem:[#allocation2] sm:$0xff]  ;;  %v1477_v41 = vld [vmem:[#allocation2 + $0x18] sm:$0xff]  ;;  %v1479_v42 = vld [vmem:[#allocation2 + $0x50] sm:$0xff] }
  0x2d   : > { %960 = vmatprep.subr.mxu0 %v124_v21  ;;  %1014 = vmatprep.subr.mxu1 %v309_v29  ;;  %v1483_v43 = vld [vmem:[#allocation2 + $0x68] sm:$0xff]  ;;  %v1491_v46 = vld [vmem:[#allocation2 + $0x40] sm:$0xff]  ;;  %v1497_v48 = vld [vmem:[#allocation2 + $0x10] sm:$0xff] }
  0x2e   : > { %961 = vmatpush3.msra.mxu0 %v124_v21  ;;  %1015 = vmatpush3.msra.mxu1 %v309_v29  ;;  %v1485_v44 = vld [vmem:[#allocation2 + $0x8] sm:$0xff]  ;;  %v1495_v47 = vld [vmem:[#allocation2 + $0x20] sm:$0xff]  ;;  %v1501_v49 = vld [vmem:[#allocation2 + $0x38] sm:$0xff] }
  0x2f   : > { %962 = vmatprep.subr.mxu0 %v123_v22  ;;  %1016 = vmatprep.subr.mxu1 %v308_v31  ;;  %v1489_v45 = vld [vmem:[#allocation2 + $0x48] sm:$0xff]  ;;  %v1503_v50 = vld [vmem:[#allocation2 + $0x60] sm:$0xff]  ;;  %v1507_v51 = vld [vmem:[#allocation2 + $0x70] sm:$0xff] }
  0x30   : > { %963 = vmatpush3.msra.mxu0 %v123_v22  ;;  %1017 = vmatpush3.msra.mxu1 %v308_v31  ;;  %v1509_v52 = vld [vmem:[#allocation2 + $0x78] sm:$0xff]  ;;  %v1513_v53 = vld [vmem:[#allocation2 + $0x28] sm:$0xff]  ;;  %v305_v55 = vld [vmem:[#allocation4 + $0x40] sm:$0xff] }
  0x31   : > { %964 = vmatprep.subr.mxu0 %v122_v23  ;;  %1018 = vmatprep.subr.mxu1 %v307_v33  ;;  %v306_v54 = vld [vmem:[#allocation4 + $0x48] sm:$0xff]  ;;  %v304_v56 = vld [vmem:[#allocation4 + $0x38] sm:$0xff]  ;;  %v303_v57 = vld [vmem:[#allocation4 + $0x30] sm:$0xff] }
  0x32   : > { %965 = vmatpush3.msra.mxu0 %v122_v23  ;;  %1019 = vmatpush3.msra.mxu1 %v307_v33  ;;  %v302_v58 = vld [vmem:[#allocation4 + $0x28] sm:$0xff]  ;;  %v301_v59 = vld [vmem:[#allocation4 + $0x20] sm:$0xff]  ;;  %v300_v60 = vld [vmem:[#allocation4 + $0x18] sm:$0xff] }
  0x33   : > { %966 = vmatprep.subr.mxu0 %v121_v26  ;;  %1020 = vmatprep.subr.mxu1 %v306_v54  ;;  %v299_v61 = vld [vmem:[#allocation4 + $0x10] sm:$0xff]  ;;  %v298_v62 = vld [vmem:[#allocation4 + $0x8] sm:$0xff]  ;;  %v297_v63 = vld [vmem:[#allocation4] sm:$0xff] }
  0x34   : > { %967 = vmatpush3.msra.mxu0 %v121_v26  ;;  %1021 = vmatpush3.msra.mxu1 %v306_v54  ;;  %v853_v0 = vld [vmem:[%s1732_s3] ss:$0 sm:$0xff] }
  0x35   : > { %968 = vmatprep.subr.mxu0 %v120_v28  ;;  %1022 = vmatprep.subr.mxu1 %v305_v55 }
  0x36   : > { %969 = vmatpush3.msra.mxu0 %v120_v28  ;;  %1023 = vmatpush3.msra.mxu1 %v305_v55 }
  0x37   : > { %970 = vmatprep.subr.mxu0 %v119_v30  ;;  %1024 = vmatprep.subr.mxu1 %v304_v56 }
  0x38   : > { %971 = vmatpush3.msra.mxu0 %v119_v30  ;;  %1025 = vmatpush3.msra.mxu1 %v304_v56 }
  0x39   : > { %972 = vmatprep.subr.mxu0 %v118_v32  ;;  %1026 = vmatprep.subr.mxu1 %v303_v57 }
  0x3a   : > { %973 = vmatpush3.msra.mxu0 %v118_v32  ;;  %1027 = vmatpush3.msra.mxu1 %v303_v57 }
  0x3b   : > { %974 = vmatprep.subr.mxu0 %v117_v34  ;;  %1028 = vmatprep.subr.mxu1 %v302_v58 }
  0x3c   : > { %975 = vmatpush3.msra.mxu0 %v117_v34  ;;  %1029 = vmatpush3.msra.mxu1 %v302_v58 }
  0x3d   : > { %976 = vmatprep.subr.mxu0 %v116_v35  ;;  %1030 = vmatprep.subr.mxu1 %v301_v59 }
  0x3e   : > { %977 = vmatpush3.msra.mxu0 %v116_v35  ;;  %1031 = vmatpush3.msra.mxu1 %v301_v59 }
  0x3f   : > { %978 = vmatprep.subr.mxu0 %v115_v36  ;;  %1032 = vmatprep.subr.mxu1 %v300_v60 }
  0x40   : > { %979 = vmatpush3.msra.mxu0 %v115_v36  ;;  %1033 = vmatpush3.msra.mxu1 %v300_v60 }
  0x41   : > { %980 = vmatprep.subr.mxu0 %v114_v37  ;;  %1034 = vmatprep.subr.mxu1 %v299_v61 }
  0x42   : > { %981 = vmatpush3.msra.mxu0 %v114_v37  ;;  %1035 = vmatpush3.msra.mxu1 %v299_v61 }
  0x43   : > { %982 = vmatprep.subr.mxu0 %v113_v38  ;;  %1036 = vmatprep.subr.mxu1 %v298_v62 }
  0x44   : > { %983 = vmatpush3.msra.mxu0 %v113_v38  ;;  %1037 = vmatpush3.msra.mxu1 %v298_v62 }
  0x45   : > { %985 = vmatmul.mubr.f32.vlgmr.msra.gmra.mxu0 %v1471_v39  ;;  %1038 = vmatprep.subr.mxu1 %v297_v63 }
  0x46   : > { %987 = vmatprep.mubr.f32.mxu0 %v1473_v40  ;;  %1039 = vmatpush3.msra.mxu1 %v297_v63 }
  0x49   : > { %988 = vmatmul.mubr.f32.gmra.mxu0 %v1477_v41 }
  0x4a   : > { %990 = vmatprep.mubr.f32.mxu0 %v1479_v42 }
  0x4d   : > { %991 = vmatmul.mubr.f32.gmra.mxu0 %v1483_v43 }
  0x4e   : > { %993 = vmatprep.mubr.f32.mxu0 %v1485_v44 }
  0x51   : > { %994 = vmatmul.mubr.f32.gmra.mxu0 %v1489_v45 }
  0x52   : > { %996 = vmatprep.mubr.f32.mxu0 %v1491_v46 }
  0x55   : > { %997 = vmatmul.mubr.f32.gmra.mxu0 %v1495_v47 }
  0x56   : > { %999 = vmatprep.mubr.f32.mxu0 %v1497_v48 }
  0x59   : > { %1000 = vmatmul.mubr.f32.gmra.mxu0 %v1501_v49 }
  0x5a   : > { %1002 = vmatprep.mubr.f32.mxu0 %v1503_v50 }
  0x5d   : > { %1003 = vmatmul.mubr.f32.gmra.mxu0 %v1507_v51 }
  0x5e   : > { %1005 = vmatprep.mubr.f32.mxu0 %v1509_v52 }
  0x61   : > { %1006 = vmatmul.mubr.f32.gmra.mxu0 %v1513_v53 }
 0x105   : > { %v986_v1 = vpop.f32.mrf.mxu0 }
 0x106   : > { %v208_v2 = vadd.f32 %v986_v1, %v853_v0 }
 0x107   : > { %v202_v3 = vpop.f32.mrf.mxu0 }
 0x108   : > { %v203_v4 = vadd.f32 %v853_v0, %v202_v3  ;;  %v606_v3 = vld [vmem:[#allocation6 + $0x68] sm:$0xff] }
 0x109   : > { %v989_v5 = vpop.f32.mrf.mxu0 }
 0x10a   : > { %1164 = vtanh.f32 %v203_v4  ;;  %v218_v6 = vadd.f32 %v989_v5, %v853_v0  ;;  %v605_v4 = vld [vmem:[#allocation6 + $0x60] sm:$0xff]  ;;  %v604_v5 = vld [vmem:[#allocation6 + $0x58] sm:$0xff] }
 0x10b   : > { %1166 = vtanh.f32 %v208_v2  ;;  %v212_v7 = vpop.f32.mrf.mxu0  ;;  %v607_v2 = vld [vmem:[#allocation6 + $0x70] sm:$0xff] }
 0x10c   : > { %v213_v8 = vadd.f32 %v853_v0, %v212_v7  ;;  %v602_v7 = vld [vmem:[#allocation6 + $0x48] sm:$0xff] }
 0x10d   : > { %v992_v9 = vpop.f32.mrf.mxu0 }
 0x10e   : > { %1168 = vtanh.f32 %v213_v8  ;;  %v228_v10 = vadd.f32 %v992_v9, %v853_v0  ;;  %v601_v8 = vld [vmem:[#allocation6 + $0x40] sm:$0xff]  ;;  %v600_v9 = vld [vmem:[#allocation6 + $0x38] sm:$0xff] }
 0x10f   : > { %1170 = vtanh.f32 %v218_v6  ;;  %v222_v11 = vpop.f32.mrf.mxu0  ;;  %v603_v6 = vld [vmem:[#allocation6 + $0x50] sm:$0xff] }
 0x110   : > { %v223_v12 = vadd.f32 %v853_v0, %v222_v11  ;;  %v598_v11 = vld [vmem:[#allocation6 + $0x28] sm:$0xff] }
 0x111   : > { %v995_v13 = vpop.f32.mrf.mxu0 }
 0x112   : > { %1172 = vtanh.f32 %v223_v12  ;;  %v238_v14 = vadd.f32 %v995_v13, %v853_v0  ;;  %v597_v12 = vld [vmem:[#allocation6 + $0x20] sm:$0xff]  ;;  %v596_v13 = vld [vmem:[#allocation6 + $0x18] sm:$0xff] }
 0x113   : > { %1174 = vtanh.f32 %v228_v10  ;;  %v232_v15 = vpop.f32.mrf.mxu0  ;;  %v599_v10 = vld [vmem:[#allocation6 + $0x30] sm:$0xff] }
 0x114   : > { %v233_v16 = vadd.f32 %v853_v0, %v232_v15  ;;  %v594_v15 = vld [vmem:[#allocation6 + $0x8] sm:$0xff] }
 0x115   : > { %v998_v17 = vpop.f32.mrf.mxu0 }
 0x116   : > { %1176 = vtanh.f32 %v233_v16  ;;  %v248_v19 = vadd.f32 %v998_v17, %v853_v0  ;;  %v593_v16 = vld [vmem:[#allocation6] sm:$0xff] }
 0x117   : > { %v1165_v18 = vpop.eup %1164  ;;  %1178 = vtanh.f32 %v238_v14  ;;  %v242_v21 = vpop.f32.mrf.mxu0  ;;  %v595_v14 = vld [vmem:[#allocation6 + $0x10] sm:$0xff]  ;;  %v1522_v17 = vld [vmem:[%s1734_s5] ss:$0 sm:$0xff] }
 0x118   : > { %v1167_v22 = vpop.eup %1166  ;;  %v243_v23 = vadd.f32 %v853_v0, %v242_v21  ;;  %1040 = vmatprep.mubr.f32.mxu1 %v1165_v18 }
 0x119   : > { %v1001_v24 = vpop.f32.mrf.mxu0  ;;  %1041 = vmatmul.mubr.f32.vlgmr.msra.gmra.mxu1 %v1167_v22 }
 0x11a   : > { %1180 = vtanh.f32 %v243_v23  ;;  %v258_v26 = vadd.f32 %v1001_v24, %v853_v0 }
 0x11b   : > { %v1169_v25 = vpop.eup %1168  ;;  %1182 = vtanh.f32 %v248_v19  ;;  %v252_v27 = vpop.f32.mrf.mxu0 }
 0x11c   : > { %v1171_v28 = vpop.eup %1170  ;;  %v253_v29 = vadd.f32 %v853_v0, %v252_v27  ;;  %1043 = vmatprep.mubr.f32.mxu1 %v1169_v25 }
 0x11d   : > { %v1004_v30 = vpop.f32.mrf.mxu0  ;;  %1044 = vmatmul.mubr.f32.gmra.mxu1 %v1171_v28 }
 0x11e   : > { %1184 = vtanh.f32 %v253_v29  ;;  %v268_v32 = vadd.f32 %v1004_v30, %v853_v0 }
 0x11f   : > { %v1173_v31 = vpop.eup %1172  ;;  %1186 = vtanh.f32 %v258_v26  ;;  %v262_v33 = vpop.f32.mrf.mxu0 }
 0x120   : > { %v1175_v34 = vpop.eup %1174  ;;  %v263_v35 = vadd.f32 %v853_v0, %v262_v33  ;;  %1046 = vmatprep.mubr.f32.mxu1 %v1173_v31 }
 0x121   : > { %v1007_v36 = vpop.f32.mrf.mxu0  ;;  %1047 = vmatmul.mubr.f32.gmra.mxu1 %v1175_v34 }
 0x122   : > { %1188 = vtanh.f32 %v263_v35  ;;  %v278_v38 = vadd.f32 %v1007_v36, %v853_v0 }
 0x123   : > { %v1177_v37 = vpop.eup %1176  ;;  %1190 = vtanh.f32 %v268_v32  ;;  %v272_v54 = vpop.f32.mrf.mxu0 }
 0x124   : > { %v1179_v55 = vpop.eup %1178  ;;  %v273_v56 = vadd.f32 %v853_v0, %v272_v54  ;;  %1049 = vmatprep.mubr.f32.mxu1 %v1177_v37  ;;  %v608_v0 = vld [vmem:[#allocation6 + $0x78] sm:$0xff] }
 0x125   : > { %1050 = vmatmul.mubr.f32.gmra.mxu1 %v1179_v55  ;;  %1064 = vmatprep.subr.mxu0 %v608_v0 }
 0x126   : > { %1192 = vtanh.f32 %v273_v56  ;;  %1120 = vmatprep.subr.mxu1 %v608_v0  ;;  %1065 = vmatpush3.msra.mxu0 %v608_v0 }
 0x127   : > { %v1181_v57 = vpop.eup %1180  ;;  %1194 = vtanh.f32 %v278_v38  ;;  %1136 = vmatpush3.msra.mxu1 %v608_v0  ;;  %1066 = vmatprep.subr.mxu0 %v607_v2 }
 0x128   : > { %v1183_v58 = vpop.eup %1182  ;;  %1052 = vmatprep.mubr.f32.mxu1 %v1181_v57  ;;  %1121 = vmatprep.subr.mxu1 %v607_v2 }
 0x129   : > { %1053 = vmatmul.mubr.f32.gmra.mxu1 %v1183_v58  ;;  %1067 = vmatpush3.msra.mxu0 %v607_v2 }
 0x12a   : > { %1137 = vmatpush3.msra.mxu1 %v607_v2  ;;  %1068 = vmatprep.subr.mxu0 %v606_v3 }
 0x12b   : > { %v1185_v59 = vpop.eup %1184  ;;  %1122 = vmatprep.subr.mxu1 %v606_v3  ;;  %1069 = vmatpush3.msra.mxu0 %v606_v3 }
 0x12c   : > { %v1187_v60 = vpop.eup %1186  ;;  %1055 = vmatprep.mubr.f32.mxu1 %v1185_v59  ;;  %1138 = vmatpush3.msra.mxu1 %v606_v3 }
 0x12d   : > { %1056 = vmatmul.mubr.f32.gmra.mxu1 %v1187_v60  ;;  %1070 = vmatprep.subr.mxu0 %v605_v4 }
 0x12e   : > { %1123 = vmatprep.subr.mxu1 %v605_v4  ;;  %1071 = vmatpush3.msra.mxu0 %v605_v4 }
 0x12f   : > { %v1189_v61 = vpop.eup %1188  ;;  %1139 = vmatpush3.msra.mxu1 %v605_v4  ;;  %1072 = vmatprep.subr.mxu0 %v604_v5 }
 0x130   : > { %v1191_v62 = vpop.eup %1190  ;;  %1058 = vmatprep.mubr.f32.mxu1 %v1189_v61  ;;  %1124 = vmatprep.subr.mxu1 %v604_v5 }
 0x131   : > { %1059 = vmatmul.mubr.f32.gmra.mxu1 %v1191_v62  ;;  %1073 = vmatpush3.msra.mxu0 %v604_v5 }
 0x132   : > { %1140 = vmatpush3.msra.mxu1 %v604_v5  ;;  %1074 = vmatprep.subr.mxu0 %v603_v6 }
 0x133   : > { %v1193_v63 = vpop.eup %1192  ;;  %1125 = vmatprep.subr.mxu1 %v603_v6  ;;  %1075 = vmatpush3.msra.mxu0 %v603_v6 }
 0x134   : > { %v1195_v1 = vpop.eup %1194  ;;  %1061 = vmatprep.mubr.f32.mxu1 %v1193_v63  ;;  %1141 = vmatpush3.msra.mxu1 %v603_v6 }
 0x135   : > { %1062 = vmatmul.mubr.f32.gmra.mxu1 %v1195_v1  ;;  %1076 = vmatprep.subr.mxu0 %v602_v7 }
 0x136   : > { %1126 = vmatprep.subr.mxu1 %v602_v7  ;;  %1077 = vmatpush3.msra.mxu0 %v602_v7 }
 0x137   : > { %1142 = vmatpush3.msra.mxu1 %v602_v7  ;;  %1078 = vmatprep.subr.mxu0 %v601_v8 }
 0x138   : > { %1127 = vmatprep.subr.mxu1 %v601_v8  ;;  %1079 = vmatpush3.msra.mxu0 %v601_v8 }
 0x139   : > { %1143 = vmatpush3.msra.mxu1 %v601_v8  ;;  %1080 = vmatprep.subr.mxu0 %v600_v9 }
 0x13a   : > { %1128 = vmatprep.subr.mxu1 %v600_v9  ;;  %1081 = vmatpush3.msra.mxu0 %v600_v9 }
 0x13b   : > { %1144 = vmatpush3.msra.mxu1 %v600_v9  ;;  %1082 = vmatprep.subr.mxu0 %v599_v10 }
 0x13c   : > { %1129 = vmatprep.subr.mxu1 %v599_v10  ;;  %1083 = vmatpush3.msra.mxu0 %v599_v10 }
 0x13d   : > { %1145 = vmatpush3.msra.mxu1 %v599_v10  ;;  %1084 = vmatprep.subr.mxu0 %v598_v11 }
 0x13e   : > { %1130 = vmatprep.subr.mxu1 %v598_v11  ;;  %1085 = vmatpush3.msra.mxu0 %v598_v11 }
 0x13f   : > { %1146 = vmatpush3.msra.mxu1 %v598_v11  ;;  %1086 = vmatprep.subr.mxu0 %v597_v12 }
 0x140   : > { %1131 = vmatprep.subr.mxu1 %v597_v12  ;;  %1087 = vmatpush3.msra.mxu0 %v597_v12 }
 0x141   : > { %1147 = vmatpush3.msra.mxu1 %v597_v12  ;;  %1088 = vmatprep.subr.mxu0 %v596_v13 }
 0x142   : > { %1132 = vmatprep.subr.mxu1 %v596_v13  ;;  %1089 = vmatpush3.msra.mxu0 %v596_v13 }
 0x143   : > { %1148 = vmatpush3.msra.mxu1 %v596_v13  ;;  %1090 = vmatprep.subr.mxu0 %v595_v14 }
 0x144   : > { %1133 = vmatprep.subr.mxu1 %v595_v14  ;;  %1091 = vmatpush3.msra.mxu0 %v595_v14 }
 0x145   : > { %1149 = vmatpush3.msra.mxu1 %v595_v14  ;;  %1092 = vmatprep.subr.mxu0 %v594_v15 }
 0x146   : > { %1134 = vmatprep.subr.mxu1 %v594_v15  ;;  %1093 = vmatpush3.msra.mxu0 %v594_v15 }
 0x147   : > { %1150 = vmatpush3.msra.mxu1 %v594_v15  ;;  %1094 = vmatprep.subr.mxu0 %v593_v16 }
 0x148   : > { %1135 = vmatprep.subr.mxu1 %v593_v16  ;;  %1095 = vmatpush3.msra.mxu0 %v593_v16 }
 0x149   : > { %1151 = vmatpush3.msra.mxu1 %v593_v16 }
 0x1d9   : > { %v1042_v18 = vpop.f32.mrf.mxu1 }
 0x1da   : > { %v1525_v19 = vadd.f32 %v1042_v18, %v1522_v17 }
 0x1db   : > { %v386_v21 = vpop.f32.mrf.mxu1 }
 0x1dc   : > { %v466_v22 = vmin.f32 %v1525_v19, 20.0  ;;  %v1529_v23 = vadd.f32 %v1522_v17, %v386_v21  ;;  %vm482_vm1 = vcmp.gt.f32.partialorder %v1525_v19, 20.0 }
 0x1dd   : > { %v1045_v24 = vpop.f32.mrf.mxu1 }
 0x1de   : > { %v499_v25 = vmul.f32 1.442695, %v466_v22  ;;  %v465_v26 = vmin.f32 %v1529_v23, 20.0  ;;  %v1533_v27 = vadd.f32 %v1045_v24, %v1522_v17  ;;  %vm481_vm0 = vcmp.gt.f32.partialorder %v1529_v23, 20.0 }
 0x1df   : > { %v396_v28 = vpop.f32.mrf.mxu1 }
 0x1e0   : > { %1196 = vpow2.f32 %v499_v25  ;;  %v497_v29 = vmul.f32 1.442695, %v465_v26  ;;  %v468_v30 = vmin.f32 %v1533_v27, 20.0  ;;  %v1537_v31 = vadd.f32 %v1522_v17, %v396_v28 }
 0x1e1   : > { %v1048_v32 = vpop.f32.mrf.mxu1  ;;  %vm484_vm3 = vcmp.gt.f32.partialorder %v1533_v27, 20.0 }
 0x1e2   : > { %1198 = vpow2.f32 %v497_v29  ;;  %v503_v33 = vmul.f32 1.442695, %v468_v30  ;;  %v467_v34 = vmin.f32 %v1537_v31, 20.0  ;;  %v1541_v35 = vadd.f32 %v1048_v32, %v1522_v17 }
 0x1e3   : > { %v406_v36 = vpop.f32.mrf.mxu1  ;;  %vm483_vm2 = vcmp.gt.f32.partialorder %v1537_v31, 20.0 }
 0x1e4   : > { %v501_v37 = vmul.f32 1.442695, %v467_v34  ;;  %v470_v38 = vmin.f32 %v1541_v35, 20.0  ;;  %v1545_v54 = vadd.f32 %v1522_v17, %v406_v36  ;;  %1200 = vpow2.f32 %v503_v33 }
 0x1e5   : > { %v1051_v55 = vpop.f32.mrf.mxu1  ;;  %vm486_vm5 = vcmp.gt.f32.partialorder %v1541_v35, 20.0 }
 0x1e6   : > { %1202 = vpow2.f32 %v501_v37  ;;  %v507_v56 = vmul.f32 1.442695, %v470_v38  ;;  %v469_v57 = vmin.f32 %v1545_v54, 20.0  ;;  %v1549_v58 = vadd.f32 %v1051_v55, %v1522_v17 }
 0x1e7   : > { %v416_v59 = vpop.f32.mrf.mxu1  ;;  %vm485_vm4 = vcmp.gt.f32.partialorder %v1545_v54, 20.0 }
 0x1e8   : > { %v505_v60 = vmul.f32 1.442695, %v469_v57  ;;  %v472_v61 = vmin.f32 %v1549_v58, 20.0  ;;  %v1553_v62 = vadd.f32 %v1522_v17, %v416_v59  ;;  %1204 = vpow2.f32 %v507_v56 }
 0x1e9   : > { %v1054_v63 = vpop.f32.mrf.mxu1  ;;  %vm488_vm7 = vcmp.gt.f32.partialorder %v1549_v58, 20.0 }
 0x1ea   : > { %1206 = vpow2.f32 %v505_v60  ;;  %v511_v1 = vmul.f32 1.442695, %v472_v61  ;;  %v471_v0 = vmin.f32 %v1553_v62, 20.0  ;;  %v1557_v2 = vadd.f32 %v1054_v63, %v1522_v17 }
 0x1eb   : > { %v426_v3 = vpop.f32.mrf.mxu1  ;;  %vm487_vm6 = vcmp.gt.f32.partialorder %v1553_v62, 20.0 }
 0x1ec   : > { %1208 = vpow2.f32 %v511_v1  ;;  %v509_v4 = vmul.f32 1.442695, %v471_v0  ;;  %v474_v5 = vmin.f32 %v1557_v2, 20.0  ;;  %v1561_v7 = vadd.f32 %v1522_v17, %v426_v3 }
 0x1ed   : > { %v1197_v6 = vpop.eup %1196  ;;  %v1057_v8 = vpop.f32.mrf.mxu1  ;;  %vm490_vm9 = vcmp.gt.f32.partialorder %v1557_v2, 20.0 }
 0x1ee   : > { %v530_v9 = vadd.f32 1.0, %v1197_v6  ;;  %1210 = vpow2.f32 %v509_v4  ;;  %v515_v10 = vmul.f32 1.442695, %v474_v5  ;;  %v1564_v11 = vadd.f32 %v1057_v8, %v1522_v17 }
 0x1ef   : > { %v1199_v12 = vpop.eup %1198  ;;  %v473_v13 = vmin.f32 %v1561_v7, 20.0  ;;  %v436_v14 = vpop.f32.mrf.mxu1  ;;  %vm489_vm8 = vcmp.gt.f32.partialorder %v1561_v7, 20.0 }
 0x1f0   : > { %v476_v15 = vmin.f32 %v1564_v11, 20.0  ;;  %v1569_v16 = vadd.f32 %v1522_v17, %v436_v14  ;;  %v529_v18 = vadd.f32 1.0, %v1199_v12  ;;  %1212 = vpow2.f32 %v515_v10 }
 0x1f1   : > { %v513_v21 = vmul.f32 1.442695, %v473_v13  ;;  %v1060_v22 = vpop.f32.mrf.mxu1  ;;  %v1201_v24 = vpop.eup %1200  ;;  %1214 = vlog2.f32 %v530_v9  ;;  %vm492_vm11 = vcmp.gt.f32.partialorder %v1564_v11, 20.0 }
 0x1f2   : > { %v519_v25 = vmul.f32 1.442695, %v476_v15  ;;  %v475_v26 = vmin.f32 %v1569_v16, 20.0  ;;  %v1573_v28 = vadd.f32 %v1060_v22, %v1522_v17  ;;  %v532_v36 = vadd.f32 1.0, %v1201_v24 }
 0x1f3   : > { %v1203_v29 = vpop.eup %1202  ;;  %1216 = vpow2.f32 %v513_v21  ;;  %v446_v30 = vpop.f32.mrf.mxu1  ;;  %vm491_vm10 = vcmp.gt.f32.partialorder %v1569_v16, 20.0 }
 0x1f4   : > { %v531_v32 = vadd.f32 1.0, %v1203_v29  ;;  %1218 = vpow2.f32 %v519_v25  ;;  %v517_v33 = vmul.f32 1.442695, %v475_v26  ;;  %v478_v34 = vmin.f32 %v1573_v28, 20.0 }
 0x1f5   : > { %v1577_v37 = vadd.f32 %v1522_v17, %v446_v30  ;;  %v1063_v38 = vpop.f32.mrf.mxu1  ;;  %1220 = vlog2.f32 %v529_v18  ;;  %v1205_v55 = vpop.eup %1204  ;;  %vm494_vm13 = vcmp.gt.f32.partialorder %v1573_v28, 20.0 }
 0x1f6   : > { %1222 = vpow2.f32 %v517_v33  ;;  %v523_v56 = vmul.f32 1.442695, %v478_v34  ;;  %v1580_v57 = vadd.f32 %v1063_v38, %v1522_v17  ;;  %v534_v4 = vadd.f32 1.0, %v1205_v55 }
 0x1f7   : > { %v1207_v59 = vpop.eup %1206  ;;  %v477_v60 = vmin.f32 %v1577_v37, 20.0  ;;  %v456_v61 = vpop.f32.mrf.mxu1  ;;  %1224 = vlog2.f32 %v531_v32  ;;  %vm493_vm12 = vcmp.gt.f32.partialorder %v1577_v37, 20.0 }
 0x1f8   : > { %v533_v63 = vadd.f32 1.0, %v1207_v59  ;;  %1226 = vpow2.f32 %v523_v56  ;;  %v480_v1 = vmin.f32 %v1580_v57, 20.0  ;;  %v1585_v0 = vadd.f32 %v1522_v17, %v456_v61 }
 0x1f9   : > { %v1209_v3 = vpop.eup %1208  ;;  %v521_v5 = vmul.f32 1.442695, %v477_v60  ;;  %1228 = vlog2.f32 %v532_v36  ;;  %vm496_vm15 = vcmp.gt.f32.partialorder %v1580_v57, 20.0 }
 0x1fa   : > { %v527_v6 = vmul.f32 1.442695, %v480_v1  ;;  %v479_v8 = vmin.f32 %v1585_v0, 20.0  ;;  %1230 = vlog2.f32 %v533_v63  ;;  %v536_v10 = vadd.f32 1.0, %v1209_v3 }
 0x1fb   : > { %v1211_v9 = vpop.eup %1210  ;;  %1232 = vpow2.f32 %v521_v5  ;;  %vm495_vm14 = vcmp.gt.f32.partialorder %v1585_v0, 20.0 }
 0x1fc   : > { %v535_v12 = vadd.f32 1.0, %v1211_v9  ;;  %1234 = vpow2.f32 %v527_v6  ;;  %v525_v13 = vmul.f32 1.442695, %v479_v8 }
 0x1fd   : > { %1236 = vlog2.f32 %v534_v4  ;;  %v1213_v14 = vpop.eup %1212 }
 0x1fe   : > { %1238 = vpow2.f32 %v525_v13  ;;  %v1215_v15 = vpop.eup %1214  ;;  %v538_v17 = vadd.f32 1.0, %v1213_v14 }
 0x1ff   : > { %1240 = vlog2.f32 %v535_v12  ;;  %v548_v25 = vmul.f32 0.6931472, %v1215_v15 }
 0x200   : > { %v1217_v18 = vpop.eup %1216  ;;  %1242 = vlog2.f32 %v536_v10 }
 0x201   : > { %v1219_v21 = vpop.eup %1218  ;;  %1244 = vlog2.f32 %v538_v17  ;;  %v537_v22 = vadd.f32 1.0, %v1217_v18  ;;  %v578_v56 = vsel %vm482_vm1, %v1525_v19, %v548_v25 }
 0x202   : > { %v1221_v24 = vpop.eup %1220  ;;  %v540_v26 = vadd.f32 1.0, %v1219_v21 }
 0x203   : > { %v1223_v29 = vpop.eup %1222  ;;  %v546_v30 = vmul.f32 0.6931472, %v1221_v24  ;;  %1246 = vlog2.f32 %v537_v22 }
 0x204   : > { %v1225_v32 = vpop.eup %1224  ;;  %v539_v33 = vadd.f32 1.0, %v1223_v29  ;;  %1248 = vlog2.f32 %v540_v26 }
 0x205   : > { %v1227_v34 = vpop.eup %1226  ;;  %v577_v36 = vsel %vm481_vm0, %v1529_v23, %v546_v30  ;;  %v550_v38 = vmul.f32 0.6931472, %v1225_v32 }
 0x206   : > { %v1229_v55 = vpop.eup %1228  ;;  %v542_v59 = vadd.f32 1.0, %v1227_v34  ;;  %1096 = vmatprep.mubr.f32.mxu0 %v577_v36  ;;  %1250 = vlog2.f32 %v539_v33 }
 0x207   : > { %v1231_v60 = vpop.eup %1230  ;;  %1097 = vmatmul.mubr.f32.vlgmr.msra.gmra.mxu0 %v578_v56  ;;  %v579_v61 = vsel %vm483_vm2, %v1537_v31, %v550_v38  ;;  %v552_v63 = vmul.f32 0.6931472, %v1229_v55 }
 0x208   : > { %v1233_v1 = vpop.eup %1232  ;;  %1099 = vmatprep.mubr.f32.mxu0 %v579_v61  ;;  %v554_v3 = vmul.f32 0.6931472, %v1231_v60  ;;  %1252 = vlog2.f32 %v542_v59 }
 0x209   : > { %v1235_v4 = vpop.eup %1234  ;;  %v541_v23 = vadd.f32 1.0, %v1233_v1  ;;  %v580_v6 = vsel %vm484_vm3, %v1533_v27, %v552_v63 }
 0x20a   : > { %v1237_v19 = vpop.eup %1236  ;;  %v544_v5 = vadd.f32 1.0, %v1235_v4  ;;  %v581_v8 = vsel %vm485_vm4, %v1545_v54, %v554_v3 }
 0x20b   : > { %v1239_v9 = vpop.eup %1238  ;;  %1100 = vmatmul.mubr.f32.gmra.mxu0 %v580_v6  ;;  %v556_v31 = vmul.f32 0.6931472, %v1237_v19  ;;  %1254 = vlog2.f32 %v541_v23 }
 0x20c   : > { %v1241_v10 = vpop.eup %1240  ;;  %v543_v12 = vadd.f32 1.0, %v1239_v9  ;;  %1102 = vmatprep.mubr.f32.mxu0 %v581_v8  ;;  %1256 = vlog2.f32 %v544_v5 }
 0x20d   : > { %v1243_v13 = vpop.eup %1242  ;;  %v558_v14 = vmul.f32 0.6931472, %v1241_v10  ;;  %v582_v17 = vsel %vm486_vm5, %v1541_v35, %v556_v31 }
 0x20e   : > { %v1245_v15 = vpop.eup %1244  ;;  %v560_v27 = vmul.f32 0.6931472, %v1243_v13  ;;  %1258 = vlog2.f32 %v543_v12 }
 0x20f   : > { %1103 = vmatmul.mubr.f32.gmra.mxu0 %v582_v17  ;;  %v583_v54 = vsel %vm487_vm6, %v1553_v62, %v558_v14  ;;  %v564_v21 = vmul.f32 0.6931472, %v1245_v15 }
 0x210   : > { %v1247_v18 = vpop.eup %1246  ;;  %1105 = vmatprep.mubr.f32.mxu0 %v583_v54  ;;  %v584_v25 = vsel %vm488_vm7, %v1549_v58, %v560_v27 }
 0x211   : > { %v1249_v22 = vpop.eup %1248  ;;  %v562_v24 = vmul.f32 0.6931472, %v1247_v18  ;;  %v586_v29 = vsel %vm490_vm9, %v1557_v2, %v564_v21 }
 0x212   : > { %v568_v30 = vmul.f32 0.6931472, %v1249_v22 }
 0x213   : > { %v1251_v26 = vpop.eup %1250  ;;  %1106 = vmatmul.mubr.f32.gmra.mxu0 %v584_v25  ;;  %v585_v35 = vsel %vm489_vm8, %v1561_v7, %v562_v24 }
 0x214   : > { %1108 = vmatprep.mubr.f32.mxu1 %v585_v35  ;;  %v566_v62 = vmul.f32 0.6931472, %v1251_v26  ;;  %v588_v34 = vsel %vm492_vm11, %v1564_v11, %v568_v30 }
 0x215   : > { %v1253_v32 = vpop.eup %1252  ;;  %1109 = vmatmul.mubr.f32.vlgmr.msra.gmra.mxu1 %v586_v29 }
 0x216   : > { %v587_v33 = vsel %vm491_vm10, %v1569_v16, %v566_v62  ;;  %v572_v36 = vmul.f32 0.6931472, %v1253_v32 }
 0x217   : > { %1111 = vmatprep.mubr.f32.mxu1 %v587_v33 }
 0x218   : > { %v1255_v58 = vpop.eup %1254  ;;  %v590_v16 = vsel %vm494_vm13, %v1573_v28, %v572_v36  ;;  %v1628_v28 = vstv %s1729_s0 }
 0x219   : > { %v1257_v38 = vpop.eup %1256  ;;  %1112 = vmatmul.mubr.f32.gmra.mxu1 %v588_v34  ;;  %v570_v7 = vmul.f32 0.6931472, %v1255_v58 }
 0x21a   : > { %v576_v59 = vmul.f32 0.6931472, %v1257_v38 }
 0x21b   : > { %v1259_v2 = vpop.eup %1258  ;;  %v589_v55 = vsel %vm493_vm12, %v1577_v37, %v570_v7  ;;  %v1623_v37 = vld [vmem:[%s1736_s7] ss:$0 sm:$0xff] }
 0x21c   : > { %1114 = vmatprep.mubr.f32.mxu1 %v589_v55  ;;  %v574_v56 = vmul.f32 0.6931472, %v1259_v2  ;;  %v592_v60 = vsel %vm496_vm15, %v1580_v57, %v576_v59 }
 0x21d   : > { %1115 = vmatmul.mubr.f32.gmra.mxu1 %v590_v16 }
 0x21e   : > { %v591_v11 = vsel %vm495_vm14, %v1585_v0, %v574_v56 }
 0x21f   : > { %1117 = vmatprep.mubr.f32.mxu1 %v591_v11 }
 0x221   : > { %1118 = vmatmul.mubr.f32.gmra.mxu1 %v592_v60 }
 0x2c7   : > { %v1098_v61 = vpop.f32.mrf.mxu0 }
 0x2c8   : > { %v688_v63 = vadd.f32 %v1098_v61, %v1623_v37 }
 0x2c9   : > { %v682_v0 = vpop.f32.mrf.mxu0 }
 0x2ca   : > { %v763_v1 = vmul.f32 %v1628_v28, %v688_v63  ;;  %v683_v3 = vadd.f32 %v1623_v37, %v682_v0 }
 0x2cb   : > { %v1101_v57 = vpop.f32.mrf.mxu0 }
 0x2cc   : > { %v779_v4 = vadd.f32 %v763_v1, %v1471_v39  ;;  %v762_v23 = vmul.f32 %v1628_v28, %v683_v3  ;;  %v698_v19 = vadd.f32 %v1101_v57, %v1623_v37 }
 0x2cd   : > { %v692_v5 = vpop.f32.mrf.mxu0 }
 0x2ce   : > { %795 = vst [vmem:[#allocation2] sm:$0xff] %v779_v4  ;;  %v778_v6 = vadd.f32 %v762_v23, %v1432_v20  ;;  %v765_v8 = vmul.f32 %v1628_v28, %v698_v19  ;;  %v693_v9 = vadd.f32 %v1623_v37, %v692_v5 }
 0x2cf   : > { %v1104_v31 = vpop.f32.mrf.mxu0 }
 0x2d0   : > { %794 = vst [vmem:[#allocation2 + $0x30] sm:$0xff] %v778_v6  ;;  %v781_v10 = vadd.f32 %v765_v8, %v1477_v41  ;;  %v764_v12 = vmul.f32 %v1628_v28, %v693_v9  ;;  %v708_v39 = vadd.f32 %v1104_v31, %v1623_v37 }
 0x2d1   : > { %v702_v13 = vpop.f32.mrf.mxu0 }
 0x2d2   : > { %797 = vst [vmem:[#allocation2 + $0x18] sm:$0xff] %v781_v10  ;;  %v780_v14 = vadd.f32 %v764_v12, %v1473_v40  ;;  %v767_v15 = vmul.f32 %v1628_v28, %v708_v39  ;;  %v703_v20 = vadd.f32 %v1623_v37, %v702_v13 }
 0x2d3   : > { %v1107_v17 = vpop.f32.mrf.mxu0 }
 0x2d4   : > { %796 = vst [vmem:[#allocation2 + $0x58] sm:$0xff] %v780_v14  ;;  %v783_v27 = vadd.f32 %v767_v15, %v1483_v43  ;;  %v766_v54 = vmul.f32 %v1628_v28, %v703_v20  ;;  %v718_v41 = vadd.f32 %v1107_v17, %v1623_v37 }
 0x2d5   : > { %v712_v18 = vpop.f32.mrf.mxu0  ;;  %v1110_v21 = vpop.f32.mrf.mxu1  ;;  %v811_v57 = vld [vmem:[#allocation2] sm:$0xff] (%p93_p10) }
 0x2d6   : > { %799 = vst [vmem:[#allocation2 + $0x68] sm:$0xff] %v783_v27  ;;  %v782_v22 = vadd.f32 %v766_v54, %v1479_v42  ;;  %v769_v24 = vmul.f32 %v1628_v28, %v718_v41  ;;  %v713_v40 = vadd.f32 %v1623_v37, %v712_v18  ;;  %v728_v25 = vadd.f32 %v1110_v21, %v1623_v37 }
 0x2d7   : > { %v722_v26 = vpop.f32.mrf.mxu1  ;;  %827 = vst [vmem:[%s1737_s8 + $0x8] sm:$0xff] (%p93_p10), %v811_v57 }
 0x2d8   : > { %798 = vst [vmem:[#allocation2 + $0x50] sm:$0xff] %v782_v22  ;;  %v785_v35 = vadd.f32 %v769_v24, %v1489_v45  ;;  %v768_v43 = vmul.f32 %v1628_v28, %v713_v40  ;;  %v771_v29 = vmul.f32 %v1628_v28, %v728_v25  ;;  %v723_v62 = vadd.f32 %v1623_v37, %v722_v26 }
 0x2d9   : > { %v1113_v30 = vpop.f32.mrf.mxu1 }
 0x2da   : > { %801 = vst [vmem:[#allocation2 + $0x48] sm:$0xff] %v785_v35  ;;  %v784_v42 = vadd.f32 %v768_v43, %v1485_v44  ;;  %v787_v32 = vadd.f32 %v771_v29, %v1495_v47  ;;  %v770_v33 = vmul.f32 %v1628_v28, %v723_v62  ;;  %v738_v58 = vadd.f32 %v1113_v30, %v1623_v37 }
 0x2db   : > { %v732_v34 = vpop.f32.mrf.mxu1  ;;  %v812_v4 = vld [vmem:[#allocation2 + $0x58] sm:$0xff] (%p93_p10) }
 0x2dc   : > { %800 = vst [vmem:[#allocation2 + $0x8] sm:$0xff] %v784_v42  ;;  %803 = vst [vmem:[#allocation2 + $0x20] sm:$0xff] %v787_v32  ;;  %v786_v45 = vadd.f32 %v770_v33, %v1491_v46  ;;  %v773_v36 = vmul.f32 %v1628_v28, %v738_v58  ;;  %v733_v38 = vadd.f32 %v1623_v37, %v732_v34 }
 0x2dd   : > { %v1116_v7 = vpop.f32.mrf.mxu1  ;;  %828 = vst [vmem:[%s1737_s8 + $0x10] sm:$0xff] (%p93_p10), %v812_v4 }
 0x2de   : > { %802 = vst [vmem:[#allocation2 + $0x40] sm:$0xff] %v786_v45  ;;  %v789_v2 = vadd.f32 %v773_v36, %v1501_v49  ;;  %v772_v44 = vmul.f32 %v1628_v28, %v733_v38  ;;  %v748_v47 = vadd.f32 %v1116_v7, %v1623_v37 }
 0x2df   : > { %v742_v55 = vpop.f32.mrf.mxu1 }
 0x2e0   : > { %805 = vst [vmem:[#allocation2 + $0x38] sm:$0xff] %v789_v2  ;;  %v788_v16 = vadd.f32 %v772_v44, %v1497_v48  ;;  %v775_v56 = vmul.f32 %v1628_v28, %v748_v47  ;;  %v743_v46 = vadd.f32 %v1623_v37, %v742_v55 }
 0x2e1   : > { %v1119_v59 = vpop.f32.mrf.mxu1  ;;  %v817_v23 = vld [vmem:[#allocation2 + $0x48] sm:$0xff] (%p93_p10) }
 0x2e2   : > { %804 = vst [vmem:[#allocation2 + $0x10] sm:$0xff] %v788_v16  ;;  %v791_v11 = vadd.f32 %v775_v56, %v1507_v51  ;;  %v774_v60 = vmul.f32 %v1628_v28, %v743_v46  ;;  %v758_v49 = vadd.f32 %v1119_v59, %v1623_v37  ;;  %833 = vst [vmem:[%s1737_s8 + $0x38] sm:$0xff] (%p93_p10), %v817_v23 }
 0x2e3   : > { %v752_v61 = vpop.f32.mrf.mxu1  ;;  %v819_v5 = vld [vmem:[#allocation2 + $0x20] sm:$0xff] (%p93_p10) }
 0x2e4   : > { %807 = vst [vmem:[#allocation2 + $0x70] sm:$0xff] %v791_v11  ;;  %v790_v63 = vadd.f32 %v774_v60, %v1503_v50  ;;  %v777_v0 = vmul.f32 %v1628_v28, %v758_v49  ;;  %v753_v48 = vadd.f32 %v1623_v37, %v752_v61  ;;  %v810_v50 = vld [vmem:[#allocation2 + $0x30] sm:$0xff] (%p93_p10)  ;;  %v815_v37 = vld [vmem:[#allocation2 + $0x68] sm:$0xff] (%p93_p10)  ;;  %835 = vst [vmem:[%s1737_s8 + $0x48] sm:$0xff] (%p93_p10), %v819_v5 }
 0x2e5   :  { %826 = vst [vmem:[%s1737_s8] sm:$0xff] (%p93_p10), %v810_v50  ;;  %831 = vst [vmem:[%s1737_s8 + $0x28] sm:$0xff] (%p93_p10), %v815_v37  ;;  %v818_v19 = vld [vmem:[#allocation2 + $0x40] sm:$0xff] (%p93_p10) }
 0x2e6   : > { %806 = vst [vmem:[#allocation2 + $0x60] sm:$0xff] %v790_v63  ;;  %v793_v1 = vadd.f32 %v777_v0, %v1513_v53  ;;  %v776_v3 = vmul.f32 %v1628_v28, %v753_v48  ;;  %95 = sbr.rel (!%p93_p10) target bundleno = 36 (0x24), region = 67  ;;  %v814_v53 = vld [vmem:[#allocation2 + $0x50] sm:$0xff] (%p93_p10)  ;;  %v816_v28 = vld [vmem:[#allocation2 + $0x8] sm:$0xff] (%p93_p10)  ;;  %834 = vst [vmem:[%s1737_s8 + $0x40] sm:$0xff] (%p93_p10), %v818_v19 }
 0x2e7   :  { %830 = vst [vmem:[%s1737_s8 + $0x20] sm:$0xff] (%p93_p10), %v814_v53  ;;  %832 = vst [vmem:[%s1737_s8 + $0x30] sm:$0xff] (%p93_p10), %v816_v28  ;;  %v821_v8 = vld [vmem:[#allocation2 + $0x38] sm:$0xff] (%p93_p10) }
 0x2e8   : > { %809 = vst [vmem:[#allocation2 + $0x28] sm:$0xff] %v793_v1  ;;  %v792_v51 = vadd.f32 %v776_v3, %v1509_v52  ;;  %v813_v52 = vld [vmem:[#allocation2 + $0x18] sm:$0xff] (%p93_p10)  ;;  %837 = vst [vmem:[%s1737_s8 + $0x58] sm:$0xff] (%p93_p10), %v821_v8 }
 0x2e9   :  { %829 = vst [vmem:[%s1737_s8 + $0x18] sm:$0xff] (%p93_p10), %v813_v52  ;;  %v820_v6 = vld [vmem:[#allocation2 + $0x10] sm:$0xff] (%p93_p10) }
 0x2ea   : > { %808 = vst [vmem:[#allocation2 + $0x78] sm:$0xff] %v792_v51  ;;  %836 = vst [vmem:[%s1737_s8 + $0x50] sm:$0xff] (%p93_p10), %v820_v6 }
 0x2eb   :  { %v823_v31 = vld [vmem:[#allocation2 + $0x70] sm:$0xff] }
 0x2ec   :  { %839 = vst [vmem:[%s1737_s8 + $0x68] sm:$0xff] %v823_v31 }
 0x2ed   :  { %v822_v9 = vld [vmem:[#allocation2 + $0x60] sm:$0xff] }
 0x2ee   :  { %838 = vst [vmem:[%s1737_s8 + $0x60] sm:$0xff] %v822_v9 }
 0x2ef   :  { %v825_v12 = vld [vmem:[#allocation2 + $0x28] sm:$0xff] }
 0x2f0   :  { %841 = vst [vmem:[%s1737_s8 + $0x78] sm:$0xff] %v825_v12 }
 0x2f1   :  { %v824_v10 = vld [vmem:[#allocation2 + $0x78] sm:$0xff] }
 0x2f2   :  { %840 = vst [vmem:[%s1737_s8 + $0x70] sm:$0xff] %v824_v10 }
 0x2f3   :  { %846 = vsyncpa [#allocation5], 1 }
 0x2f4   :  { %847 = vsyncpa [#allocation7], 1 }

</bundles_post_ra>
